<compile_context>
chip_gen: v5e
topology: v5e:2x2
jax: 0.10.0
libtpu: 0.0.40
codegen_flags: <defaults>
</compile_context>

<pallas_src>
import numpy as np
import jax
import jax.numpy as jnp
from jax.experimental import pallas as pl
from jax.experimental.pallas import tpu as pltpu

INPUT_DIM = 3
EMBED_DIM = 4
LAYER_NUMS = 5
NEG_SLOPE = 0.01  # nn.LeakyReLU default

# packed-parameter layout (rows x 4*EMBED_DIM lanes):
#   rows 0:3          -> w_first  (3, 4)   in columns 0:4
#   row  3            -> b_first  (1, 4)   in columns 0:4
#   then per layer l (stride 2D+1 = 9 rows, base row 4):
#   rows r0 : r0+2D   -> fused GRU weight (2D, 4D)
#   row  r0+2D        -> fused GRU bias   (1, 4D)
_PARAM_BASE = INPUT_DIM + 1
_PARAM_STRIDE = 2 * EMBED_DIM + 1
_PARAM_ROWS = _PARAM_BASE + LAYER_NUMS * _PARAM_STRIDE  # 49
_PARAM_COLS = 4 * EMBED_DIM                             # 16


# ----------------------------------------------------------------------------
# Pallas kernel: one graph per grid step (whole Encoder forward for that graph).
# ----------------------------------------------------------------------------
def encoder_kernel(x_ref, a_ref, p_ref, out_ref):
    D = EMBED_DIM
    x = x_ref[...]            # (N, INPUT_DIM) f32
    a = a_ref[...]            # (N, N) normalized adjacency, f32
    p = p_ref[...]            # (49, 16) packed parameters, f32

    # first linear + LeakyReLU
    w_first = p[0:INPUT_DIM, 0:D]                       # (3, 4)
    b_first = p[INPUT_DIM:INPUT_DIM + 1, 0:D]           # (1, 4)
    h = jnp.dot(x, w_first, preferred_element_type=jnp.float32) + b_first
    h = jnp.where(h >= 0, h, NEG_SLOPE * h)             # (N, D)

    max_out = None
    for l in range(LAYER_NUMS):                         # static unroll
        r0 = _PARAM_BASE + l * _PARAM_STRIDE
        wf = p[r0:r0 + 2 * D, :]                        # (2D, 4D) fused weight
        bf = p[r0 + 2 * D:r0 + 2 * D + 1, :]            # (1, 4D)  fused bias

        # GCNConv (no learned weight in this module): A_hat @ h
        agg = jnp.dot(a, h, preferred_element_type=jnp.float32)       # (N, D)

        # single-step GRU (input = agg, hidden = h), fused gate matmul.
        xh = jnp.concatenate([agg, h], axis=1)                         # (N, 2D)
        g = jnp.dot(xh, wf, preferred_element_type=jnp.float32) + bf   # (N, 4D)
        r = jax.nn.sigmoid(g[:, 0 * D:1 * D])
        z = jax.nn.sigmoid(g[:, 1 * D:2 * D])
        gh_n = g[:, 3 * D:4 * D]                                       # W_hn h + b_hn
        n = jnp.tanh(g[:, 2 * D:3 * D] + (r - 1.0) * gh_n)             # = gi_n + r*gh_n
        h = (1.0 - z) * n + z * h                                      # (N, D)

        max_out = h if max_out is None else jnp.maximum(max_out, h)

    out_ref[...] = max_out.astype(out_ref.dtype)


def encoder_forward(x, a_hat, packed_params):
    """x: (B, N, INPUT_DIM) f32, a_hat: (B, N, N) f32, packed_params: (49, 16) f32."""
    B, N, _ = x.shape
    Rp, Cp = packed_params.shape
    return pl.pallas_call(
        encoder_kernel,
        out_shape=jax.ShapeDtypeStruct((B, N, EMBED_DIM), jnp.float32),
        grid_spec=pltpu.PrefetchScalarGridSpec(
            num_scalar_prefetch=0,
            grid=(B,),
            in_specs=[
                pl.BlockSpec((None, N, INPUT_DIM), lambda b: (b, 0, 0)),
                pl.BlockSpec((None, N, N), lambda b: (b, 0, 0)),
                # constant block index -> parameters DMA'd once, stay VMEM-resident
                pl.BlockSpec((Rp, Cp), lambda b: (0, 0)),
            ],
            out_specs=pl.BlockSpec((None, N, EMBED_DIM), lambda b: (b, 0, 0)),
        ),
        compiler_params=pltpu.CompilerParams(
            dimension_semantics=("parallel",),   # shard batch across TCs (v7x)
        ),
    )(x, a_hat, packed_params)


# ----------------------------------------------------------------------------
# Glue: GCN normalized adjacency, matching the custom GCNConv in the spec
# (add_self_loops; deg = degree(row) i.e. SOURCE index; norm = d^-1/2[row]*d^-1/2[col];
#  aggregation onto col, messages gathered from row).
# ----------------------------------------------------------------------------
def build_norm_adj(edge_index, num_nodes):
    row, col = edge_index[0], edge_index[1]
    loops = jnp.arange(num_nodes, dtype=edge_index.dtype)
    row = jnp.concatenate([row, loops])
    col = jnp.concatenate([col, loops])
    deg = jnp.zeros((num_nodes,), jnp.float32).at[row].add(1.0)
    dis = deg ** -0.5
    norm = dis[row] * dis[col]
    a = jnp.zeros((num_nodes, num_nodes), jnp.float32).at[col, row].add(norm)
    return a


# ----------------------------------------------------------------------------
# Deterministic parameter init (synthetic; shapes match the nn.Module) and
# offline packing/fusion into a single kernel buffer.
# ----------------------------------------------------------------------------
def init_params(key):
    ks = jax.random.split(key, 2 + 4 * LAYER_NUMS)
    p = {
        # nn.Linear(3, 4): stored transposed -> (3, 4)
        "w_first": 0.3 * jax.random.normal(ks[0], (INPUT_DIM, EMBED_DIM), jnp.float32),
        "b_first": 0.1 * jax.random.normal(ks[1], (1, EMBED_DIM), jnp.float32),
    }
    w_ih, w_hh, b_ih, b_hh = [], [], [], []
    for l in range(LAYER_NUMS):
        # nn.GRU(4, 4): weight_ih (12,4), weight_hh (12,4), biases (12,)
        # stored transposed as (4, 12); biases as (1, 12).  Gate order: r, z, n.
        w_ih.append(0.3 * jax.random.normal(ks[2 + 4 * l], (EMBED_DIM, 3 * EMBED_DIM), jnp.float32))
        w_hh.append(0.3 * jax.random.normal(ks[3 + 4 * l], (EMBED_DIM, 3 * EMBED_DIM), jnp.float32))
        b_ih.append(0.1 * jax.random.normal(ks[4 + 4 * l], (1, 3 * EMBED_DIM), jnp.float32))
        b_hh.append(0.1 * jax.random.normal(ks[5 + 4 * l], (1, 3 * EMBED_DIM), jnp.float32))
    p["w_ih"] = jnp.stack(w_ih)   # (L, 4, 12)
    p["w_hh"] = jnp.stack(w_hh)   # (L, 4, 12)
    p["b_ih"] = jnp.stack(b_ih)   # (L, 1, 12)
    p["b_hh"] = jnp.stack(b_hh)   # (L, 1, 12)
    return p


def pack_params(params):
    """Pack + pre-fuse all parameters into one (49, 16) f32 buffer."""
    D = EMBED_DIM
    P = np.zeros((_PARAM_ROWS, _PARAM_COLS), np.float32)
    P[0:INPUT_DIM, 0:D] = np.asarray(params["w_first"])
    P[INPUT_DIM, 0:D] = np.asarray(params["b_first"])[0]
    for l in range(LAYER_NUMS):
        w_ih = np.asarray(params["w_ih"][l])   # (D, 3D)
        w_hh = np.asarray(params["w_hh"][l])   # (D, 3D)
        b_ih = np.asarray(params["b_ih"][l])[0]
        b_hh = np.asarray(params["b_hh"][l])[0]
        wf = np.zeros((2 * D, 4 * D), np.float32)
        wf[0:D, 0:3 * D] = w_ih
        wf[D:2 * D, 0:3 * D] = w_hh
        wf[D:2 * D, 3 * D:4 * D] = w_hh[:, 2 * D:3 * D]   # gh_n column block
        bf = np.zeros((4 * D,), np.float32)
        bf[0:3 * D] = b_ih + b_hh
        bf[3 * D:4 * D] = b_hh[2 * D:3 * D]
        r0 = _PARAM_BASE + l * _PARAM_STRIDE
        P[r0:r0 + 2 * D, :] = wf
        P[r0 + 2 * D, :] = bf
    return jnp.asarray(P)


# ----------------------------------------------------------------------------
# Pure-JAX reference (mirrors the PyTorch forward, un-fused) for correctness.
# ----------------------------------------------------------------------------
def encoder_reference(x, a_hat, params):
    D = EMBED_DIM
    h = x @ params["w_first"] + params["b_first"]
    h = jnp.where(h >= 0, h, NEG_SLOPE * h)
    outs = []
    for l in range(LAYER_NUMS):
        agg = a_hat @ h
        gi = agg @ params["w_ih"][l] + params["b_ih"][l]
        gh = h @ params["w_hh"][l] + params["b_hh"][l]
        r = jax.nn.sigmoid(gi[:, :D] + gh[:, :D])
        z = jax.nn.sigmoid(gi[:, D:2 * D] + gh[:, D:2 * D])
        n = jnp.tanh(gi[:, 2 * D:] + r * gh[:, 2 * D:])
        h = (1.0 - z) * n + z * h
        outs.append(h)
    return jnp.max(jnp.stack(outs), axis=0)


if __name__ == "__main__":
    key = jax.random.PRNGKey(0)
    k_x, k_p = jax.random.split(key)

    B, N = 4, 8  # B graphs, N nodes each
    x = jax.random.normal(k_x, (B, N, INPUT_DIM), jnp.float32)

    # deterministic per-batch graphs: bidirectional ring + a batch-dependent chord
    a_list = []
    base = np.arange(N)
    for b in range(B):
        ring_dst = (base + 1) % N
        chord_dst = (base + 2 + b) % N
        src = np.concatenate([base, ring_dst, base, chord_dst])
        dst = np.concatenate([ring_dst, base, chord_dst, base])
        ei = jnp.asarray(np.stack([src, dst]), dtype=jnp.int32)
        a_list.append(build_norm_adj(ei, N))
    a_hat = jnp.stack(a_list)                       # (B, N, N)

    params = init_params(k_p)
    packed = pack_params(params)                    # (49, 16)

    out = encoder_forward(x, a_hat, packed)
    out = jax.block_until_ready(out)

    ref = jnp.stack([encoder_reference(x[b], a_hat[b], params) for b in range(B)])
    np.testing.assert_allclose(np.asarray(out), np.asarray(ref), rtol=1e-5, atol=1e-5)

    print("KERNEL_OK")
</pallas_src>

<mosaic_0001>
module attributes {stable_mosaic.version = 11 : i64} {
  func.func @encoder_kernel(%arg0: i32, %arg1: memref<1x8x3xf32, #tpu.memory_space<vmem>>, %arg2: memref<1x8x8xf32, #tpu.memory_space<vmem>>, %arg3: memref<49x16xf32, #tpu.memory_space<vmem>>, %arg4: memref<1x8x4xf32, #tpu.memory_space<vmem>>) attributes {dimension_semantics = [#tpu.dimension_semantics<parallel>], iteration_bounds = array<i64: 4>, scalar_prefetch = 0 : i64, scratch_operands = 0 : i64, tpu.core_type = #tpu.core_type<tc>, window_params = [{transform_indices = @transform_0, window_bounds = array<i64: 1, 8, 3>}, {transform_indices = @transform_1, window_bounds = array<i64: 1, 8, 8>}, {pipeline_mode = #tpu.pipeline_mode<synchronous>, transform_indices = @transform_2, window_bounds = array<i64: 49, 16>}, {transform_indices = @transform_3, window_bounds = array<i64: 1, 8, 4>}]} {
    %c0 = arith.constant 0 : index
    %c0_0 = arith.constant 0 : index
    %c0_1 = arith.constant 0 : index
    %0 = vector.load %arg1[%c0, %c0_0, %c0_1] : memref<1x8x3xf32, #tpu.memory_space<vmem>>, vector<1x8x3xf32>
    %1 = vector.shape_cast %0 : vector<1x8x3xf32> to vector<8x3xf32>
    %c0_2 = arith.constant 0 : index
    %c0_3 = arith.constant 0 : index
    %c0_4 = arith.constant 0 : index
    %2 = vector.load %arg2[%c0_2, %c0_3, %c0_4] : memref<1x8x8xf32, #tpu.memory_space<vmem>>, vector<1x8x8xf32>
    %3 = vector.shape_cast %2 : vector<1x8x8xf32> to vector<8x8xf32>
    %c0_5 = arith.constant 0 : index
    %c0_6 = arith.constant 0 : index
    %4 = vector.load %arg3[%c0_5, %c0_6] : memref<49x16xf32, #tpu.memory_space<vmem>>, vector<49x16xf32>
    %5 = vector.extract_strided_slice %4 {offsets = [0, 0], sizes = [3, 4], strides = [1, 1]} : vector<49x16xf32> to vector<3x4xf32>
    %6 = vector.extract_strided_slice %4 {offsets = [3, 0], sizes = [1, 4], strides = [1, 1]} : vector<49x16xf32> to vector<1x4xf32>
    %cst = arith.constant dense<0.000000e+00> : vector<8x4xf32>
    %7 = tpu.matmul %1, %5, %cst {dimension_numbers = #tpu.dot_dimension_numbers<[1], [0], [0], [1], [0, 0, 1, 1], [], []>} : vector<8x3xf32>, vector<3x4xf32>, vector<8x4xf32> -> vector<8x4xf32>
    %8 = vector.broadcast %6 : vector<1x4xf32> to vector<8x4xf32>
    %9 = arith.addf %7, %8 : vector<8x4xf32>
    %cst_7 = arith.constant 0.000000e+00 : f32
    %10 = vector.broadcast %cst_7 : f32 to vector<8x4xf32>
    %11 = arith.cmpf oge, %9, %10 : vector<8x4xf32>
    %cst_8 = arith.constant 0.00999999977 : f32
    %12 = vector.broadcast %cst_8 : f32 to vector<8x4xf32>
    %13 = arith.mulf %12, %9 : vector<8x4xf32>
    %14 = arith.select %11, %9, %13 : vector<8x4xi1>, vector<8x4xf32>
    %15 = vector.extract_strided_slice %4 {offsets = [4, 0], sizes = [8, 16], strides = [1, 1]} : vector<49x16xf32> to vector<8x16xf32>
    %16 = vector.extract_strided_slice %4 {offsets = [12, 0], sizes = [1, 16], strides = [1, 1]} : vector<49x16xf32> to vector<1x16xf32>
    %cst_9 = arith.constant dense<0.000000e+00> : vector<8x4xf32>
    %17 = tpu.matmul %3, %14, %cst_9 {dimension_numbers = #tpu.dot_dimension_numbers<[1], [0], [0], [1], [0, 0, 1, 1], [], []>} : vector<8x8xf32>, vector<8x4xf32>, vector<8x4xf32> -> vector<8x4xf32>
    %18 = tpu.concatenate %17, %14 in 1 : vector<8x4xf32>, vector<8x4xf32> -> vector<8x8xf32>
    %cst_10 = arith.constant dense<0.000000e+00> : vector<8x16xf32>
    %19 = tpu.matmul %18, %15, %cst_10 {dimension_numbers = #tpu.dot_dimension_numbers<[1], [0], [0], [1], [0, 0, 1, 1], [], []>} : vector<8x8xf32>, vector<8x16xf32>, vector<8x16xf32> -> vector<8x16xf32>
    %20 = vector.broadcast %16 : vector<1x16xf32> to vector<8x16xf32>
    %21 = arith.addf %19, %20 : vector<8x16xf32>
    %22 = vector.extract_strided_slice %21 {offsets = [0, 0], sizes = [8, 4], strides = [1, 1]} : vector<8x16xf32> to vector<8x4xf32>
    %23 = arith.negf %22 : vector<8x4xf32>
    %24 = math.exp %23 : vector<8x4xf32>
    %cst_11 = arith.constant 1.000000e+00 : f32
    %25 = vector.broadcast %cst_11 : f32 to vector<8x4xf32>
    %26 = arith.addf %25, %24 : vector<8x4xf32>
    %27 = arith.divf %25, %26 : vector<8x4xf32>
    %28 = vector.extract_strided_slice %21 {offsets = [0, 4], sizes = [8, 4], strides = [1, 1]} : vector<8x16xf32> to vector<8x4xf32>
    %29 = arith.negf %28 : vector<8x4xf32>
    %30 = math.exp %29 : vector<8x4xf32>
    %cst_12 = arith.constant 1.000000e+00 : f32
    %31 = vector.broadcast %cst_12 : f32 to vector<8x4xf32>
    %32 = arith.addf %31, %30 : vector<8x4xf32>
    %33 = arith.divf %31, %32 : vector<8x4xf32>
    %34 = vector.extract_strided_slice %21 {offsets = [0, 12], sizes = [8, 4], strides = [1, 1]} : vector<8x16xf32> to vector<8x4xf32>
    %35 = vector.extract_strided_slice %21 {offsets = [0, 8], sizes = [8, 4], strides = [1, 1]} : vector<8x16xf32> to vector<8x4xf32>
    %cst_13 = arith.constant 1.000000e+00 : f32
    %36 = vector.broadcast %cst_13 : f32 to vector<8x4xf32>
    %37 = arith.subf %27, %36 : vector<8x4xf32>
    %38 = arith.mulf %37, %34 : vector<8x4xf32>
    %39 = arith.addf %35, %38 : vector<8x4xf32>
    %40 = math.tanh %39 : vector<8x4xf32>
    %cst_14 = arith.constant 1.000000e+00 : f32
    %41 = vector.broadcast %cst_14 : f32 to vector<8x4xf32>
    %42 = arith.subf %41, %33 : vector<8x4xf32>
    %43 = arith.mulf %42, %40 : vector<8x4xf32>
    %44 = arith.mulf %33, %14 : vector<8x4xf32>
    %45 = arith.addf %43, %44 : vector<8x4xf32>
    %46 = vector.extract_strided_slice %4 {offsets = [13, 0], sizes = [8, 16], strides = [1, 1]} : vector<49x16xf32> to vector<8x16xf32>
    %47 = vector.extract_strided_slice %4 {offsets = [21, 0], sizes = [1, 16], strides = [1, 1]} : vector<49x16xf32> to vector<1x16xf32>
    %cst_15 = arith.constant dense<0.000000e+00> : vector<8x4xf32>
    %48 = tpu.matmul %3, %45, %cst_15 {dimension_numbers = #tpu.dot_dimension_numbers<[1], [0], [0], [1], [0, 0, 1, 1], [], []>} : vector<8x8xf32>, vector<8x4xf32>, vector<8x4xf32> -> vector<8x4xf32>
    %49 = tpu.concatenate %48, %45 in 1 : vector<8x4xf32>, vector<8x4xf32> -> vector<8x8xf32>
    %cst_16 = arith.constant dense<0.000000e+00> : vector<8x16xf32>
    %50 = tpu.matmul %49, %46, %cst_16 {dimension_numbers = #tpu.dot_dimension_numbers<[1], [0], [0], [1], [0, 0, 1, 1], [], []>} : vector<8x8xf32>, vector<8x16xf32>, vector<8x16xf32> -> vector<8x16xf32>
    %51 = vector.broadcast %47 : vector<1x16xf32> to vector<8x16xf32>
    %52 = arith.addf %50, %51 : vector<8x16xf32>
    %53 = vector.extract_strided_slice %52 {offsets = [0, 0], sizes = [8, 4], strides = [1, 1]} : vector<8x16xf32> to vector<8x4xf32>
    %54 = arith.negf %53 : vector<8x4xf32>
    %55 = math.exp %54 : vector<8x4xf32>
    %cst_17 = arith.constant 1.000000e+00 : f32
    %56 = vector.broadcast %cst_17 : f32 to vector<8x4xf32>
    %57 = arith.addf %56, %55 : vector<8x4xf32>
    %58 = arith.divf %56, %57 : vector<8x4xf32>
    %59 = vector.extract_strided_slice %52 {offsets = [0, 4], sizes = [8, 4], strides = [1, 1]} : vector<8x16xf32> to vector<8x4xf32>
    %60 = arith.negf %59 : vector<8x4xf32>
    %61 = math.exp %60 : vector<8x4xf32>
    %cst_18 = arith.constant 1.000000e+00 : f32
    %62 = vector.broadcast %cst_18 : f32 to vector<8x4xf32>
    %63 = arith.addf %62, %61 : vector<8x4xf32>
    %64 = arith.divf %62, %63 : vector<8x4xf32>
    %65 = vector.extract_strided_slice %52 {offsets = [0, 12], sizes = [8, 4], strides = [1, 1]} : vector<8x16xf32> to vector<8x4xf32>
    %66 = vector.extract_strided_slice %52 {offsets = [0, 8], sizes = [8, 4], strides = [1, 1]} : vector<8x16xf32> to vector<8x4xf32>
    %cst_19 = arith.constant 1.000000e+00 : f32
    %67 = vector.broadcast %cst_19 : f32 to vector<8x4xf32>
    %68 = arith.subf %58, %67 : vector<8x4xf32>
    %69 = arith.mulf %68, %65 : vector<8x4xf32>
    %70 = arith.addf %66, %69 : vector<8x4xf32>
    %71 = math.tanh %70 : vector<8x4xf32>
    %cst_20 = arith.constant 1.000000e+00 : f32
    %72 = vector.broadcast %cst_20 : f32 to vector<8x4xf32>
    %73 = arith.subf %72, %64 : vector<8x4xf32>
    %74 = arith.mulf %73, %71 : vector<8x4xf32>
    %75 = arith.mulf %64, %45 : vector<8x4xf32>
    %76 = arith.addf %74, %75 : vector<8x4xf32>
    %77 = arith.maximumf %45, %76 : vector<8x4xf32>
    %78 = vector.extract_strided_slice %4 {offsets = [22, 0], sizes = [8, 16], strides = [1, 1]} : vector<49x16xf32> to vector<8x16xf32>
    %79 = vector.extract_strided_slice %4 {offsets = [30, 0], sizes = [1, 16], strides = [1, 1]} : vector<49x16xf32> to vector<1x16xf32>
    %cst_21 = arith.constant dense<0.000000e+00> : vector<8x4xf32>
    %80 = tpu.matmul %3, %76, %cst_21 {dimension_numbers = #tpu.dot_dimension_numbers<[1], [0], [0], [1], [0, 0, 1, 1], [], []>} : vector<8x8xf32>, vector<8x4xf32>, vector<8x4xf32> -> vector<8x4xf32>
    %81 = tpu.concatenate %80, %76 in 1 : vector<8x4xf32>, vector<8x4xf32> -> vector<8x8xf32>
    %cst_22 = arith.constant dense<0.000000e+00> : vector<8x16xf32>
    %82 = tpu.matmul %81, %78, %cst_22 {dimension_numbers = #tpu.dot_dimension_numbers<[1], [0], [0], [1], [0, 0, 1, 1], [], []>} : vector<8x8xf32>, vector<8x16xf32>, vector<8x16xf32> -> vector<8x16xf32>
    %83 = vector.broadcast %79 : vector<1x16xf32> to vector<8x16xf32>
    %84 = arith.addf %82, %83 : vector<8x16xf32>
    %85 = vector.extract_strided_slice %84 {offsets = [0, 0], sizes = [8, 4], strides = [1, 1]} : vector<8x16xf32> to vector<8x4xf32>
    %86 = arith.negf %85 : vector<8x4xf32>
    %87 = math.exp %86 : vector<8x4xf32>
    %cst_23 = arith.constant 1.000000e+00 : f32
    %88 = vector.broadcast %cst_23 : f32 to vector<8x4xf32>
    %89 = arith.addf %88, %87 : vector<8x4xf32>
    %90 = arith.divf %88, %89 : vector<8x4xf32>
    %91 = vector.extract_strided_slice %84 {offsets = [0, 4], sizes = [8, 4], strides = [1, 1]} : vector<8x16xf32> to vector<8x4xf32>
    %92 = arith.negf %91 : vector<8x4xf32>
    %93 = math.exp %92 : vector<8x4xf32>
    %cst_24 = arith.constant 1.000000e+00 : f32
    %94 = vector.broadcast %cst_24 : f32 to vector<8x4xf32>
    %95 = arith.addf %94, %93 : vector<8x4xf32>
    %96 = arith.divf %94, %95 : vector<8x4xf32>
    %97 = vector.extract_strided_slice %84 {offsets = [0, 12], sizes = [8, 4], strides = [1, 1]} : vector<8x16xf32> to vector<8x4xf32>
    %98 = vector.extract_strided_slice %84 {offsets = [0, 8], sizes = [8, 4], strides = [1, 1]} : vector<8x16xf32> to vector<8x4xf32>
    %cst_25 = arith.constant 1.000000e+00 : f32
    %99 = vector.broadcast %cst_25 : f32 to vector<8x4xf32>
    %100 = arith.subf %90, %99 : vector<8x4xf32>
    %101 = arith.mulf %100, %97 : vector<8x4xf32>
    %102 = arith.addf %98, %101 : vector<8x4xf32>
    %103 = math.tanh %102 : vector<8x4xf32>
    %cst_26 = arith.constant 1.000000e+00 : f32
    %104 = vector.broadcast %cst_26 : f32 to vector<8x4xf32>
    %105 = arith.subf %104, %96 : vector<8x4xf32>
    %106 = arith.mulf %105, %103 : vector<8x4xf32>
    %107 = arith.mulf %96, %76 : vector<8x4xf32>
    %108 = arith.addf %106, %107 : vector<8x4xf32>
    %109 = arith.maximumf %77, %108 : vector<8x4xf32>
    %110 = vector.extract_strided_slice %4 {offsets = [31, 0], sizes = [8, 16], strides = [1, 1]} : vector<49x16xf32> to vector<8x16xf32>
    %111 = vector.extract_strided_slice %4 {offsets = [39, 0], sizes = [1, 16], strides = [1, 1]} : vector<49x16xf32> to vector<1x16xf32>
    %cst_27 = arith.constant dense<0.000000e+00> : vector<8x4xf32>
    %112 = tpu.matmul %3, %108, %cst_27 {dimension_numbers = #tpu.dot_dimension_numbers<[1], [0], [0], [1], [0, 0, 1, 1], [], []>} : vector<8x8xf32>, vector<8x4xf32>, vector<8x4xf32> -> vector<8x4xf32>
    %113 = tpu.concatenate %112, %108 in 1 : vector<8x4xf32>, vector<8x4xf32> -> vector<8x8xf32>
    %cst_28 = arith.constant dense<0.000000e+00> : vector<8x16xf32>
    %114 = tpu.matmul %113, %110, %cst_28 {dimension_numbers = #tpu.dot_dimension_numbers<[1], [0], [0], [1], [0, 0, 1, 1], [], []>} : vector<8x8xf32>, vector<8x16xf32>, vector<8x16xf32> -> vector<8x16xf32>
    %115 = vector.broadcast %111 : vector<1x16xf32> to vector<8x16xf32>
    %116 = arith.addf %114, %115 : vector<8x16xf32>
    %117 = vector.extract_strided_slice %116 {offsets = [0, 0], sizes = [8, 4], strides = [1, 1]} : vector<8x16xf32> to vector<8x4xf32>
    %118 = arith.negf %117 : vector<8x4xf32>
    %119 = math.exp %118 : vector<8x4xf32>
    %cst_29 = arith.constant 1.000000e+00 : f32
    %120 = vector.broadcast %cst_29 : f32 to vector<8x4xf32>
    %121 = arith.addf %120, %119 : vector<8x4xf32>
    %122 = arith.divf %120, %121 : vector<8x4xf32>
    %123 = vector.extract_strided_slice %116 {offsets = [0, 4], sizes = [8, 4], strides = [1, 1]} : vector<8x16xf32> to vector<8x4xf32>
    %124 = arith.negf %123 : vector<8x4xf32>
    %125 = math.exp %124 : vector<8x4xf32>
    %cst_30 = arith.constant 1.000000e+00 : f32
    %126 = vector.broadcast %cst_30 : f32 to vector<8x4xf32>
    %127 = arith.addf %126, %125 : vector<8x4xf32>
    %128 = arith.divf %126, %127 : vector<8x4xf32>
    %129 = vector.extract_strided_slice %116 {offsets = [0, 12], sizes = [8, 4], strides = [1, 1]} : vector<8x16xf32> to vector<8x4xf32>
    %130 = vector.extract_strided_slice %116 {offsets = [0, 8], sizes = [8, 4], strides = [1, 1]} : vector<8x16xf32> to vector<8x4xf32>
    %cst_31 = arith.constant 1.000000e+00 : f32
    %131 = vector.broadcast %cst_31 : f32 to vector<8x4xf32>
    %132 = arith.subf %122, %131 : vector<8x4xf32>
    %133 = arith.mulf %132, %129 : vector<8x4xf32>
    %134 = arith.addf %130, %133 : vector<8x4xf32>
    %135 = math.tanh %134 : vector<8x4xf32>
    %cst_32 = arith.constant 1.000000e+00 : f32
    %136 = vector.broadcast %cst_32 : f32 to vector<8x4xf32>
    %137 = arith.subf %136, %128 : vector<8x4xf32>
    %138 = arith.mulf %137, %135 : vector<8x4xf32>
    %139 = arith.mulf %128, %108 : vector<8x4xf32>
    %140 = arith.addf %138, %139 : vector<8x4xf32>
    %141 = arith.maximumf %109, %140 : vector<8x4xf32>
    %142 = vector.extract_strided_slice %4 {offsets = [40, 0], sizes = [8, 16], strides = [1, 1]} : vector<49x16xf32> to vector<8x16xf32>
    %143 = vector.extract_strided_slice %4 {offsets = [48, 0], sizes = [1, 16], strides = [1, 1]} : vector<49x16xf32> to vector<1x16xf32>
    %cst_33 = arith.constant dense<0.000000e+00> : vector<8x4xf32>
    %144 = tpu.matmul %3, %140, %cst_33 {dimension_numbers = #tpu.dot_dimension_numbers<[1], [0], [0], [1], [0, 0, 1, 1], [], []>} : vector<8x8xf32>, vector<8x4xf32>, vector<8x4xf32> -> vector<8x4xf32>
    %145 = tpu.concatenate %144, %140 in 1 : vector<8x4xf32>, vector<8x4xf32> -> vector<8x8xf32>
    %cst_34 = arith.constant dense<0.000000e+00> : vector<8x16xf32>
    %146 = tpu.matmul %145, %142, %cst_34 {dimension_numbers = #tpu.dot_dimension_numbers<[1], [0], [0], [1], [0, 0, 1, 1], [], []>} : vector<8x8xf32>, vector<8x16xf32>, vector<8x16xf32> -> vector<8x16xf32>
    %147 = vector.broadcast %143 : vector<1x16xf32> to vector<8x16xf32>
    %148 = arith.addf %146, %147 : vector<8x16xf32>
    %149 = vector.extract_strided_slice %148 {offsets = [0, 0], sizes = [8, 4], strides = [1, 1]} : vector<8x16xf32> to vector<8x4xf32>
    %150 = arith.negf %149 : vector<8x4xf32>
    %151 = math.exp %150 : vector<8x4xf32>
    %cst_35 = arith.constant 1.000000e+00 : f32
    %152 = vector.broadcast %cst_35 : f32 to vector<8x4xf32>
    %153 = arith.addf %152, %151 : vector<8x4xf32>
    %154 = arith.divf %152, %153 : vector<8x4xf32>
    %155 = vector.extract_strided_slice %148 {offsets = [0, 4], sizes = [8, 4], strides = [1, 1]} : vector<8x16xf32> to vector<8x4xf32>
    %156 = arith.negf %155 : vector<8x4xf32>
    %157 = math.exp %156 : vector<8x4xf32>
    %cst_36 = arith.constant 1.000000e+00 : f32
    %158 = vector.broadcast %cst_36 : f32 to vector<8x4xf32>
    %159 = arith.addf %158, %157 : vector<8x4xf32>
    %160 = arith.divf %158, %159 : vector<8x4xf32>
    %161 = vector.extract_strided_slice %148 {offsets = [0, 12], sizes = [8, 4], strides = [1, 1]} : vector<8x16xf32> to vector<8x4xf32>
    %162 = vector.extract_strided_slice %148 {offsets = [0, 8], sizes = [8, 4], strides = [1, 1]} : vector<8x16xf32> to vector<8x4xf32>
    %cst_37 = arith.constant 1.000000e+00 : f32
    %163 = vector.broadcast %cst_37 : f32 to vector<8x4xf32>
    %164 = arith.subf %154, %163 : vector<8x4xf32>
    %165 = arith.mulf %164, %161 : vector<8x4xf32>
    %166 = arith.addf %162, %165 : vector<8x4xf32>
    %167 = math.tanh %166 : vector<8x4xf32>
    %cst_38 = arith.constant 1.000000e+00 : f32
    %168 = vector.broadcast %cst_38 : f32 to vector<8x4xf32>
    %169 = arith.subf %168, %160 : vector<8x4xf32>
    %170 = arith.mulf %169, %167 : vector<8x4xf32>
    %171 = arith.mulf %160, %140 : vector<8x4xf32>
    %172 = arith.addf %170, %171 : vector<8x4xf32>
    %173 = arith.maximumf %141, %172 : vector<8x4xf32>
    %c0_39 = arith.constant 0 : index
    %c0_40 = arith.constant 0 : index
    %c0_41 = arith.constant 0 : index
    %174 = vector.load %arg4[%c0_39, %c0_40, %c0_41] : memref<1x8x4xf32, #tpu.memory_space<vmem>>, vector<1x8x4xf32>
    %175 = vector.shape_cast %174 : vector<1x8x4xf32> to vector<8x4xf32>
    %176 = vector.shape_cast %173 : vector<8x4xf32> to vector<1x8x4xf32>
    tpu.vector_store %arg4[%c0_39, %c0_40, %c0_41], %176 {strides = array<i32>} : memref<1x8x4xf32, #tpu.memory_space<vmem>>, vector<1x8x4xf32>,
    return
  }
  func.func @transform_0(%arg0: i32) -> (i32, i32, i32) {
    %c0_i32 = arith.constant 0 : i32
    %c0_i32_0 = arith.constant 0 : i32
    %c0_i32_1 = arith.constant 0 : i32
    return %arg0, %c0_i32, %c0_i32_0 : i32, i32, i32
  }
  func.func @transform_1(%arg0: i32) -> (i32, i32, i32) {
    %c0_i32 = arith.constant 0 : i32
    %c0_i32_0 = arith.constant 0 : i32
    %c0_i32_1 = arith.constant 0 : i32
    return %arg0, %c0_i32, %c0_i32_0 : i32, i32, i32
  }
  func.func @transform_2(%arg0: i32) -> (i32, i32) {
    %c0_i32 = arith.constant 0 : i32
    %c0_i32_0 = arith.constant 0 : i32
    %c0_i32_1 = arith.constant 0 : i32
    return %c0_i32, %c0_i32_0 : i32, i32
  }
  func.func @transform_3(%arg0: i32) -> (i32, i32, i32) {
    %c0_i32 = arith.constant 0 : i32
    %c0_i32_0 = arith.constant 0 : i32
    %c0_i32_1 = arith.constant 0 : i32
    return %arg0, %c0_i32, %c0_i32_0 : i32, i32, i32
  }
}

</mosaic_0001>

<bundles_post_ra>
// kernel: tpu_custom_call.1
= control target key start
LH: loop header
LB: loop body
LE: loop exit
PB: predicated region body
PF: predicated region fallthrough
CT: control target
= control target key end

     0   :  { %s873_s12 = smov 0   ;;  %s982_s0 = inlined_call_operand.vmem [shape: f32[4,8,3], index: 0, kind: input, shape index: {}]   ;;  %s983_s1 = inlined_call_operand.vmem [shape: f32[4,8,8], index: 1, kind: input, shape index: {}]   ;;  %s984_s2 = inlined_call_operand.vmem [shape: f32[49,16], index: 2, kind: input, shape index: {}]   ;;  %s985_s3 = inlined_call_operand.vmem [shape: f32[4,8,4], index: 3, kind: output, shape index: {}]  }
   0x1 LB: > { %s766_s13 = sadd.s32 4294967295, %s847_s12   ;;  %p770_p0 = scmp.ge.s32.totalorder %s847_s12, 1  ;;  %s847_s12 = sphi %s873_s12, %s13_s12  }
   0x2   : > { %p145_p1 = scmp.lt.s32.totalorder %s847_s12, 5 }
   0x4   : > { %p146_p2 = pnand %p770_p0, %p145_p1 }
   0x5   : > { %p171_p3 = scmp.lt.s32.totalorder (!%p146_p2), %s766_s13, 3  ;;  %s849_s23 = smov (!%p146_p2), 4  }
   0x6   : > { %149 = sbr.rel (%p146_p2) target bundleno = 3666 (0xe52), region = 32  ;;  %s850_s26 = smov (!%p146_p2), 116  }
   0x7   : > { %s851_s27 = smov (!%p146_p2), 8   ;;  %s852_s28 = smov (!%p146_p2), 124  }
   0xb   : > { %v185_v0 = vld [vmem:[%s984_s2] sm:$0xff]  ;;  %vm197_vm0 = vcmask 1042432   ;;  %s987_s13 = smov (!%p171_p3, %s766_s13), 3  ;;  %vm193_vm1 = vcmask 23552   ;;  %vm224_vm3 = vcmask 64512   ;;  %v186_v9 = vld [vmem:[%s984_s2 + $0x8] sm:$0xff] }
   0xc   : > { %774 = vmatpush.msk.msra.mxu0 %vm197_vm0, %v185_v0  ;;  %s885_s16 = sshll.u32 %s987_s13, 3  ;;  %v192_v2 = vperm.slane %v185_v0, 3  ;;  %v257_v8 = vrot.slane %v185_v0, 4  ;;  %v258_v10 = vrot.slane %v186_v9, 4  ;;  %vm256_vm4 = vcmask 1043456   ;;  %v187_v43 = vld [vmem:[%s984_s2 + $0x10] sm:$0xff] }
   0xd   : > { %s174_s19 = scalar_lea.vmem %s982_s0, %s885_s16  ;;  %s178_s22 = scalar_lea.vmem %s983_s1, %s885_s16  ;;  %vm252_vm5 = vcmask 31744   ;;  %v254_v15 = vperm.slane %v186_v9, 4  ;;  %v350_v44 = vrot.slane %v186_v9, 5  ;;  %v351_v45 = vrot.slane %v187_v43, 5 }
   0xe   : > { %v183_v1 = vld [vmem:[%s174_s19] sm:$0xff]  ;;  %v259_v11 = vsel %vm256_vm4, %v257_v8, %v258_v10  ;;  %v348_v49 = vperm.slane %v187_v43, 5  ;;  %vm444_vm14 = vcmask 1041408   ;;  %vm539_vm4 = vcmask 1040384   ;;  %s182_s15 = scalar_lea.vmem %s985_s3, %s885_s16 }
   0xf   : > { %775 = vmatmul.msk.f32.vlgmr.msra.gmra.mxu0 %vm193_vm1, %v183_v1  ;;  %v895_v6 = vld [vmem:[%s178_s22] sm:$0xff]  ;;  %279 = vmatpush.msra.mxu2 %v259_v11  ;;  %v352_v46 = vsel %vm197_vm0, %v350_v44, %v351_v45 }
  0x10   : > { %372 = vmatpush.msrb.mxu0 %v352_v46 }
  0x8c   : > { %v218_v3 = vpop.f32.mrf.mxu0 }
  0x8d   : > { %v219_v4 = vadd.f32 %v218_v3, %v192_v2 }
  0x8f   : > { %vm221_vm2 = vcmp.ge.f32.partialorder %v219_v4, 0.0  ;;  %v222_v5 = vmul.f32 0.01, %v219_v4 }
  0x91   : > { %v223_v7 = vsel %vm221_vm2, %v219_v4, %v222_v5 }
  0x92   : > { %249 = vrot.lane.b32.xlu0 %v223_v7, %s849_s23  ;;  %243 = vmatpush.msra.mxu1 %v223_v7 }
  0x93   : > { %776 = vmatmul.msk.f32.vlgmr.msra.gmra.mxu1 %vm224_vm3, %v895_v6 }
 0x104   : > { %v250_v12 = vpop.permute.xlu0 %249 }
 0x110   : > { %v245_v13 = vpop.f32.mrf.mxu1 }
 0x111   : > { %v253_v14 = vsel %vm252_vm5, %v245_v13, %v250_v12 }
 0x112   : > { %777 = vmatmul.msk.f32.vlgmr.msra.gmra.mxu2 %vm224_vm3, %v253_v14  ;;  %v188_v14 = vld [vmem:[%s984_s2 + $0x18] sm:$0xff] }
 0x195   : > { %v281_v16 = vpop.f32.mrf.mxu2 }
 0x196   : > { %v282_v17 = vadd.f32 %v281_v16, %v254_v15  ;;  %v445_v15 = vrot.slane %v187_v43, 6  ;;  %v446_v16 = vrot.slane %v188_v14, 6 }
 0x198   : > { %305 = vrot.lane.b32.xlu0 %v282_v17, %s850_s26  ;;  %v778_v18 = vmul.f32 -1.442695, %v282_v17 }
 0x19a   : > { %811 = vpow2.f32 %v778_v18 }
 0x1a0   : > { %v812_v19 = vpop.eup %811 }
 0x1a1   : > { %v287_v20 = vadd.f32 1.0, %v812_v19 }
 0x1a3   : > { %813 = vrcp.f32 %v287_v20  ;;  %v299_v26 = vand.u32 2147483648, %v287_v20  ;;  %vm293_vm7 = vweird.f32 %v287_v20  ;;  %v297_v27 = vand.u32 2147483647, %v287_v20 }
 0x1a5   : > { %v300_v29 = vor.u32 1.1754944e-38, %v299_v26  ;;  %vm298_vm9 = vcmp.eq.f32.partialorder %v297_v27, 8.507059e+37 }
 0x1a9   : > { %v814_v21 = vpop.eup %813 }
 0x1aa   : > { %v289_v22 = vmul.f32 %v814_v21, %v287_v20  ;;  %vm294_vm6 = vweird.f32 %v814_v21  ;;  %v442_v20 = vperm.slane %v188_v14, 6 }
 0x1ab   : > { %vm295_vm8 = vmor %vm293_vm7, %vm294_vm6 }
 0x1ac   : > { %v290_v23 = vsub.f32 1.0, %v289_v22 }
 0x1ae   : > { %v291_v24 = vmul.f32 %v814_v21, %v290_v23 }
 0x1b0   : > { %v292_v25 = vadd.f32 %v814_v21, %v291_v24 }
 0x1b2   : > { %v296_v28 = vsel %vm295_vm8, %v814_v21, %v292_v25 }
 0x1b3   : > { %v301_v30 = vsel %vm298_vm9, %v300_v29, %v296_v28 }
 0x1b4   : > { %v779_v31 = vadd.f32 -1.0, %v301_v30  ;;  %v315_v37 = vsub.f32 1.0, %v301_v30  ;;  %v321_v39 = vmul.f32 %v301_v30, %v250_v12 }
 0x20a   : > { %v306_v32 = vpop.permute.xlu0 %305 }
 0x20b   : > { %v308_v33 = vmul.f32 %v779_v31, %v306_v32 }
 0x20d   : > { %310 = vrot.lane.b32.xlu1 %v308_v33, %s851_s27 }
 0x27f   : > { %v311_v34 = vpop.permute.xlu1 %310 }
 0x280   : > { %v313_v35 = vadd.f32 %v311_v34, %v282_v17  ;;  %v447_v17 = vsel %vm444_vm14, %v445_v15, %v446_v16 }
 0x281   : > { %467 = vmatpush.msrb.mxu2 %v447_v17 }
 0x282   : > { %815 = vtanh.f32 %v313_v35 }
 0x288   : > { %v816_v36 = vpop.eup %815 }
 0x289   : > { %317 = vrot.lane.b32.xlu1 %v816_v36, %s852_s28 }
 0x2fb   : > { %v318_v38 = vpop.permute.xlu1 %317 }
 0x2fc   : > { %v320_v40 = vmul.f32 %v318_v38, %v315_v37 }
 0x2fe   : > { %v907_v41 = vadd.f32 %v321_v39, %v320_v40 }
 0x300   : > { %324 = vrot.lane.b32.xlu2 %v907_v41, %s852_s28 }
 0x35a   : > { %v325_v42 = vpop.permute.xlu2 %324 }
 0x35b   : > { %342 = vmatpush.msra.mxu3 %v325_v42 }
 0x35c   : > { %780 = vmatmul.msk.f32.vlgmr.msra.gmra.mxu3 %vm224_vm3, %v895_v6 }
 0x3df   : > { %v344_v47 = vpop.f32.mrf.mxu3 }
 0x3e0   : > { %v347_v48 = vsel %vm252_vm5, %v344_v47, %v907_v41 }
 0x3e1   : > { %781 = vmatmul.msk.f32.vlgmr.msrb.gmra.mxu0 %vm224_vm3, %v347_v48 }
 0x45e   : > { %v374_v50 = vpop.f32.mrf.mxu0 }
 0x45f   : > { %v375_v51 = vadd.f32 %v374_v50, %v348_v49  ;;  %v189_v49 = vld [vmem:[%s984_s2 + $0x20] sm:$0xff]  ;;  %v540_v50 = vrot.slane %v188_v14, 7 }
 0x461   : > { %398 = vrot.lane.b32.xlu2 %v375_v51, %s850_s26  ;;  %v782_v52 = vmul.f32 -1.442695, %v375_v51 }
 0x463   : > { %817 = vpow2.f32 %v782_v52 }
 0x469   : > { %v818_v53 = vpop.eup %817 }
 0x46a   : > { %v380_v54 = vadd.f32 1.0, %v818_v53 }
 0x46c   : > { %819 = vrcp.f32 %v380_v54  ;;  %v392_v60 = vand.u32 2147483648, %v380_v54  ;;  %vm386_vm11 = vweird.f32 %v380_v54  ;;  %v390_v61 = vand.u32 2147483647, %v380_v54 }
 0x46e   : > { %v393_v63 = vor.u32 1.1754944e-38, %v392_v60  ;;  %vm391_vm13 = vcmp.eq.f32.partialorder %v390_v61, 8.507059e+37 }
 0x472   : > { %v820_v55 = vpop.eup %819 }
 0x473   : > { %v382_v56 = vmul.f32 %v820_v55, %v380_v54  ;;  %vm387_vm10 = vweird.f32 %v820_v55 }
 0x474   : > { %vm388_vm12 = vmor %vm386_vm11, %vm387_vm10 }
 0x475   : > { %v383_v57 = vsub.f32 1.0, %v382_v56 }
 0x477   : > { %v384_v58 = vmul.f32 %v820_v55, %v383_v57 }
 0x479   : > { %v385_v59 = vadd.f32 %v820_v55, %v384_v58 }
 0x47b   : > { %v389_v62 = vsel %vm388_vm12, %v820_v55, %v385_v59  ;;  %v537_v55 = vperm.slane %v189_v49, 7 }
 0x47c   : > { %v394_v0 = vsel %vm391_vm13, %v393_v63, %v389_v62 }
 0x47d   : > { %v783_v1 = vadd.f32 -1.0, %v394_v0  ;;  %v408_v8 = vsub.f32 1.0, %v394_v0  ;;  %v414_v10 = vmul.f32 %v394_v0, %v907_v41 }
 0x4bb   : > { %v399_v2 = vpop.permute.xlu2 %398 }
 0x4bc   : > { %v401_v3 = vmul.f32 %v783_v1, %v399_v2 }
 0x4be   : > { %403 = vrot.lane.b32.xlu0 %v401_v3, %s851_s27 }
 0x530   : > { %v404_v4 = vpop.permute.xlu0 %403 }
 0x531   : > { %v406_v5 = vadd.f32 %v404_v4, %v375_v51  ;;  %v541_v51 = vrot.slane %v189_v49, 7 }
 0x533   : > { %821 = vtanh.f32 %v406_v5  ;;  %v542_v52 = vsel %vm539_vm4, %v540_v50, %v541_v51 }
 0x534   : > { %562 = vmatpush.msra.mxu0 %v542_v52 }
 0x539   : > { %v822_v7 = vpop.eup %821 }
 0x53a   : > { %410 = vrot.lane.b32.xlu1 %v822_v7, %s852_s28 }
 0x5ac   : > { %v411_v9 = vpop.permute.xlu1 %410 }
 0x5ad   : > { %v413_v11 = vmul.f32 %v411_v9, %v408_v8 }
 0x5af   : > { %v924_v12 = vadd.f32 %v414_v10, %v413_v11 }
 0x5b1   : > { %418 = vrot.lane.b32.xlu2 %v924_v12, %s852_s28 }
 0x60b   : > { %v419_v13 = vpop.permute.xlu2 %418 }
 0x60c   : > { %436 = vmatpush.msrb.mxu1 %v419_v13 }
 0x60d   : > { %784 = vmatmul.msk.f32.vlgmr.msrb.gmra.mxu1 %vm224_vm3, %v895_v6 }
 0x68a   : > { %v438_v18 = vpop.f32.mrf.mxu1 }
 0x68b   : > { %v441_v19 = vsel %vm252_vm5, %v438_v18, %v924_v12 }
 0x68c   : > { %785 = vmatmul.msk.f32.vlgmr.msrb.gmra.mxu2 %vm224_vm3, %v441_v19 }
 0x70f   : > { %v469_v21 = vpop.f32.mrf.mxu2 }
 0x710   : > { %v470_v22 = vadd.f32 %v469_v21, %v442_v20  ;;  %v190_v21 = vld [vmem:[%s984_s2 + $0x28] sm:$0xff] }
 0x711   : > { %651 = vmatpush.msra.mxu2 %v190_v21 }
 0x712   : > { %493 = vrot.lane.b32.xlu0 %v470_v22, %s850_s26  ;;  %v786_v23 = vmul.f32 -1.442695, %v470_v22 }
 0x714   : > { %823 = vpow2.f32 %v786_v23 }
 0x71a   : > { %v824_v24 = vpop.eup %823 }
 0x71b   : > { %v475_v25 = vadd.f32 1.0, %v824_v24  ;;  %v810_v24 = vld [vmem:[%s984_s2 + $0x30] ss:$0 sm:$0xff] }
 0x71d   : > { %825 = vrcp.f32 %v475_v25  ;;  %v487_v31 = vand.u32 2147483648, %v475_v25  ;;  %vm481_vm0 = vweird.f32 %v475_v25  ;;  %v485_v32 = vand.u32 2147483647, %v475_v25 }
 0x71f   : > { %v488_v34 = vor.u32 1.1754944e-38, %v487_v31  ;;  %vm486_vm2 = vcmp.eq.f32.partialorder %v485_v32, 8.507059e+37 }
 0x723   : > { %v826_v26 = vpop.eup %825 }
 0x724   : > { %v477_v27 = vmul.f32 %v826_v26, %v475_v25  ;;  %vm482_vm15 = vweird.f32 %v826_v26 }
 0x725   : > { %vm483_vm1 = vmor %vm481_vm0, %vm482_vm15 }
 0x726   : > { %v478_v28 = vsub.f32 1.0, %v477_v27 }
 0x728   : > { %v479_v29 = vmul.f32 %v826_v26, %v478_v28 }
 0x72a   : > { %v480_v30 = vadd.f32 %v826_v26, %v479_v29 }
 0x72c   : > { %v484_v33 = vsel %vm483_vm1, %v826_v26, %v480_v30 }
 0x72d   : > { %v489_v35 = vsel %vm486_vm2, %v488_v34, %v484_v33 }
 0x72e   : > { %v787_v36 = vadd.f32 -1.0, %v489_v35  ;;  %v503_v43 = vsub.f32 1.0, %v489_v35  ;;  %v509_v45 = vmul.f32 %v489_v35, %v924_v12 }
 0x784   : > { %v494_v37 = vpop.permute.xlu0 %493 }
 0x785   : > { %v496_v38 = vmul.f32 %v787_v36, %v494_v37 }
 0x787   : > { %498 = vrot.lane.b32.xlu1 %v496_v38, %s851_s27 }
 0x7f9   : > { %v499_v39 = vpop.permute.xlu1 %498 }
 0x7fa   : > { %v501_v40 = vadd.f32 %v499_v39, %v470_v22 }
 0x7fc   : > { %827 = vtanh.f32 %v501_v40 }
 0x802   : > { %v828_v42 = vpop.eup %827 }
 0x803   : > { %505 = vrot.lane.b32.xlu2 %v828_v42, %s852_s28 }
 0x85d   : > { %v506_v44 = vpop.permute.xlu2 %505 }
 0x85e   : > { %v508_v46 = vmul.f32 %v506_v44, %v503_v43 }
 0x860   : > { %v940_v47 = vadd.f32 %v509_v45, %v508_v46 }
 0x862   : > { %513 = vrot.lane.b32.xlu0 %v940_v47, %s852_s28 }
 0x8d4   : > { %v514_v48 = vpop.permute.xlu0 %513 }
 0x8d5   : > { %531 = vmatpush.msrb.mxu3 %v514_v48  ;;  %v416_v48 = vmax.f32 %v907_v41, %v924_v12 }
 0x8d6   : > { %788 = vmatmul.msk.f32.vlgmr.msrb.gmra.mxu3 %vm224_vm3, %v895_v6 }
 0x8d7   : > { %v511_v52 = vmax.f32 %v416_v48, %v940_v47 }
 0x959   : > { %v533_v53 = vpop.f32.mrf.mxu3 }
 0x95a   : > { %v536_v54 = vsel %vm252_vm5, %v533_v53, %v940_v47 }
 0x95b   : > { %789 = vmatmul.msk.f32.vlgmr.msra.gmra.mxu0 %vm224_vm3, %v536_v54 }
 0x9d8   : > { %v564_v56 = vpop.f32.mrf.mxu0 }
 0x9d9   : > { %v565_v57 = vadd.f32 %v564_v56, %v537_v55 }
 0x9db   : > { %588 = vrot.lane.b32.xlu1 %v565_v57, %s850_s26  ;;  %v790_v58 = vmul.f32 -1.442695, %v565_v57 }
 0x9dd   : > { %829 = vpow2.f32 %v790_v58 }
 0x9e3   : > { %v830_v59 = vpop.eup %829 }
 0x9e4   : > { %v570_v60 = vadd.f32 1.0, %v830_v59 }
 0x9e6   : > { %831 = vrcp.f32 %v570_v60  ;;  %v582_v2 = vand.u32 2147483648, %v570_v60  ;;  %vm576_vm7 = vweird.f32 %v570_v60  ;;  %v580_v3 = vand.u32 2147483647, %v570_v60 }
 0x9e8   : > { %v583_v5 = vor.u32 1.1754944e-38, %v582_v2  ;;  %vm581_vm9 = vcmp.eq.f32.partialorder %v580_v3, 8.507059e+37 }
 0x9ec   : > { %v832_v61 = vpop.eup %831 }
 0x9ed   : > { %v572_v62 = vmul.f32 %v832_v61, %v570_v60  ;;  %vm577_vm6 = vweird.f32 %v832_v61 }
 0x9ee   : > { %vm578_vm8 = vmor %vm576_vm7, %vm577_vm6 }
 0x9ef   : > { %v573_v63 = vsub.f32 1.0, %v572_v62 }
 0x9f1   : > { %v574_v0 = vmul.f32 %v832_v61, %v573_v63 }
 0x9f3   : > { %v575_v1 = vadd.f32 %v832_v61, %v574_v0 }
 0x9f5   : > { %v579_v4 = vsel %vm578_vm8, %v832_v61, %v575_v1 }
 0x9f6   : > { %v584_v7 = vsel %vm581_vm9, %v583_v5, %v579_v4 }
 0x9f7   : > { %v791_v8 = vadd.f32 -1.0, %v584_v7  ;;  %v598_v15 = vsub.f32 1.0, %v584_v7  ;;  %v604_v17 = vmul.f32 %v584_v7, %v940_v47 }
 0xa4d   : > { %v589_v9 = vpop.permute.xlu1 %588 }
 0xa4e   : > { %v591_v10 = vmul.f32 %v791_v8, %v589_v9 }
 0xa50   : > { %593 = vrot.lane.b32.xlu2 %v591_v10, %s851_s27 }
 0xaaa   : > { %v594_v11 = vpop.permute.xlu2 %593 }
 0xaab   : > { %v596_v13 = vadd.f32 %v594_v11, %v565_v57 }
 0xaad   : > { %833 = vtanh.f32 %v596_v13 }
 0xab3   : > { %v834_v14 = vpop.eup %833 }
 0xab4   : > { %600 = vrot.lane.b32.xlu0 %v834_v14, %s852_s28 }
 0xb26   : > { %v601_v16 = vpop.permute.xlu0 %600 }
 0xb27   : > { %v603_v18 = vmul.f32 %v601_v16, %v598_v15 }
 0xb29   : > { %v605_v19 = vadd.f32 %v604_v17, %v603_v18 }
 0xb2b   : > { %608 = vrot.lane.b32.xlu1 %v605_v19, %s852_s28  ;;  %v606_v54 = vmax.f32 %v511_v52, %v605_v19 }
 0xb9d   : > { %v609_v20 = vpop.permute.xlu1 %608 }
 0xb9e   : > { %626 = vmatpush.msra.mxu1 %v609_v20 }
 0xb9f   : > { %792 = vmatmul.msk.f32.vlgmr.msra.gmra.mxu1 %vm224_vm3, %v895_v6 }
 0xc1c   : > { %v628_v22 = vpop.f32.mrf.mxu1 }
 0xc1d   : > { %v631_v23 = vsel %vm252_vm5, %v628_v22, %v605_v19 }
 0xc1e   : > { %793 = vmatmul.msk.f32.vlgmr.msra.gmra.mxu2 %vm224_vm3, %v631_v23 }
 0xca1   : > { %v653_v25 = vpop.f32.mrf.mxu2 }
 0xca2   : > { %v654_v26 = vadd.f32 %v810_v24, %v653_v25 }
 0xca4   : > { %677 = vrot.lane.b32.xlu2 %v654_v26, %s850_s26  ;;  %v794_v27 = vmul.f32 -1.442695, %v654_v26 }
 0xca6   : > { %835 = vpow2.f32 %v794_v27 }
 0xcac   : > { %v836_v6 = vpop.eup %835 }
 0xcad   : > { %v659_v28 = vadd.f32 1.0, %v836_v6 }
 0xcaf   : > { %837 = vrcp.f32 %v659_v28  ;;  %v671_v34 = vand.u32 2147483648, %v659_v28  ;;  %vm665_vm3 = vweird.f32 %v659_v28  ;;  %v669_v35 = vand.u32 2147483647, %v659_v28 }
 0xcb1   : > { %v672_v37 = vor.u32 1.1754944e-38, %v671_v34  ;;  %vm670_vm12 = vcmp.eq.f32.partialorder %v669_v35, 8.507059e+37 }
 0xcb5   : > { %v838_v29 = vpop.eup %837 }
 0xcb6   : > { %v661_v30 = vmul.f32 %v838_v29, %v659_v28  ;;  %vm666_vm10 = vweird.f32 %v838_v29 }
 0xcb7   : > { %vm667_vm11 = vmor %vm665_vm3, %vm666_vm10 }
 0xcb8   : > { %v662_v31 = vsub.f32 1.0, %v661_v30 }
 0xcba   : > { %v663_v32 = vmul.f32 %v838_v29, %v662_v31 }
 0xcbc   : > { %v664_v33 = vadd.f32 %v838_v29, %v663_v32 }
 0xcbe   : > { %v668_v36 = vsel %vm667_vm11, %v838_v29, %v664_v33 }
 0xcbf   : > { %v673_v38 = vsel %vm670_vm12, %v672_v37, %v668_v36 }
 0xcc0   : > { %v795_v39 = vadd.f32 -1.0, %v673_v38  ;;  %v687_v46 = vsub.f32 1.0, %v673_v38  ;;  %v693_v50 = vmul.f32 %v673_v38, %v605_v19 }
 0xcfe   : > { %v678_v40 = vpop.permute.xlu2 %677 }
 0xcff   : > { %v680_v42 = vmul.f32 %v795_v39, %v678_v40 }
 0xd01   : > { %682 = vrot.lane.b32.xlu0 %v680_v42, %s851_s27 }
 0xd73   : > { %v683_v43 = vpop.permute.xlu0 %682 }
 0xd74   : > { %v685_v44 = vadd.f32 %v683_v43, %v654_v26 }
 0xd76   : > { %839 = vtanh.f32 %v685_v44 }
 0xd7c   : > { %v840_v45 = vpop.eup %839 }
 0xd7d   : > { %689 = vrot.lane.b32.xlu1 %v840_v45, %s852_s28 }
 0xdef   : > { %v690_v49 = vpop.permute.xlu1 %689 }
 0xdf0   : > { %v692_v51 = vmul.f32 %v690_v49, %v687_v46 }
 0xdf2   : > { %v694_v53 = vadd.f32 %v693_v50, %v692_v51 }
 0xdf4   : > { %v695_v55 = vmax.f32 %v606_v54, %v694_v53 }
 0xdf6   : > { %697 = vrot.lane.b32.xlu2 %v695_v55, %s852_s28 }
 0xe50   : > { %v698_v56 = vpop.permute.xlu2 %697 }
 0xe51   : > { %700 = vst.msk [vmem:[%s182_s15] sm:$0xff] %vm252_vm5, %v698_v56 }
 0xe52 PF: > { %s13_s12 = sadd.s32 1, %s847_s12  }
 0xe53   : > { %p10_p4 = scmp.ge.s32.totalorder %s13_s12, 6  }
 0xe55   :  { %12 = sbr.rel (!%p10_p4) target bundleno = 1 (0x1), region = 65 }

</bundles_post_ra>
